<compile_context>
chip_gen: v7x
topology: tpu7x:2x2x1
jax: 0.10.0
libtpu: 0.0.40
codegen_flags: <defaults>
</compile_context>

<pallas_src>
import functools

import jax
import jax.numpy as jnp
from jax import lax
from jax.experimental import pallas as pl
from jax.experimental.pallas import tpu as pltpu


def _round_up(x: int, m: int) -> int:
    return ((x + m - 1) // m) * m


def _self_training_kernel(y_ref, yt_ref, out_ref, *, threshold: float):
    tb, c = y_ref.shape
    out_lanes = out_ref.shape[1]

    y = y_ref[...].astype(jnp.float32)     # student logits (tile)
    yt = yt_ref[...].astype(jnp.float32)   # teacher logits (detached)

    col_ids = lax.broadcasted_iota(jnp.int32, (tb, c), 1)

    # ---- softmax(y_target).max(dim=1): confidence + pseudo labels ----
    yt_max = jnp.max(yt, axis=1, keepdims=True)                    # (tb, 1)
    denom = jnp.sum(jnp.exp(yt - yt_max), axis=1, keepdims=True)   # (tb, 1)
    # max prob = exp(0) / denom; exact divide (tiny, (tb,1)) for the reported
    # confidence output.
    confidence = 1.0 / denom
    is_max = yt >= yt_max
    # first occurrence of the row maximum (matches torch argmax tie-break)
    labels = jnp.min(jnp.where(is_max, col_ids, c), axis=1, keepdims=True)

    # ---- confidence mask: (confidence >= threshold)  <=>  (denom <= 1/thr)
    # since denom > 0; compared on the denominator so the mask does not
    # depend on the divide.  threshold is a trace-time constant.
    if threshold > 0.0:
        mask = (denom <= (1.0 / threshold)).astype(jnp.float32)    # (tb, 1)
    else:
        mask = jnp.ones_like(denom)

    # ---- cross_entropy(y, pseudo_labels, reduction='none') * mask ----
    y_max = jnp.max(y, axis=1, keepdims=True)
    lse = jnp.log(jnp.sum(jnp.exp(y - y_max), axis=1, keepdims=True)) + y_max
    is_label = col_ids == labels                                   # one compare
    picked = jnp.sum(jnp.where(is_label, y, 0.0), axis=1, keepdims=True)
    masked_ce = (lse - picked) * mask                              # (tb, 1)

    labels_f = labels.astype(jnp.float32)  # exact for C < 2**24

    # ---- pack per-sample results into the narrow output slab ----
    # col 0: mask, 1: confidence, 2: pseudo label, 3: masked CE, rest: 0.
    # Built in vregs with a 4-deep select and written with a single store
    # (cheaper than 4 separate masked column stores at this lane width).
    lane = lax.broadcasted_iota(jnp.int32, (tb, out_lanes), 1)
    out_ref[...] = jnp.where(
        lane == 0, mask,
        jnp.where(lane == 1, confidence,
                  jnp.where(lane == 2, labels_f,
                            jnp.where(lane == 3, masked_ce, 0.0))))


def _plan(batch: int, num_classes: int, in_itemsize: int, out_lanes: int):
    """Pick (tile_rows, num_tiles, n_input_buffers, vmem_limit_bytes)."""
    if batch <= 8:
        rows = batch                       # single full block (tiny B)
    else:
        # working-set bytes per tile row:
        #   2 inputs x 2 pipeline buffers (native dtype)
        # + ~4x C f32 compute temporaries (upcasts + exp intermediates)
        # + 2 output pipeline buffers
        row_bytes = (2 * 2 * num_classes * in_itemsize
                     + 4 * num_classes * 4
                     + 2 * out_lanes * 4)
        budget = 24 << 20                  # conservative across v5e/v6e/v7x
        rows = max(8, budget // row_bytes)
        rows = min(rows, 4096)             # >= ~4 MiB/step of input for small C
        if batch >= 16:
            # guarantee >= 2 grid steps so the "parallel" axis shards across
            # both v7x TensorCores
            rows = min(rows, _round_up(pl.cdiv(batch, 2), 8))
        rows = min(rows, _round_up(batch, 8))
        rows = max(8, (rows // 8) * 8)     # sublane alignment

    num_tiles = pl.cdiv(batch, rows)
    per_step_in = rows * num_classes * in_itemsize
    # deeper input prefetch only when each DMA is too small to hide latency
    # behind compute and there are enough grid steps to benefit
    n_in_bufs = 3 if (num_tiles >= 4 and per_step_in < (2 << 20)) else 2

    used = rows * (2 * n_in_bufs * num_classes * in_itemsize
                   + 4 * num_classes * 4
                   + 2 * out_lanes * 4)
    vmem_limit = int(min(48 << 20, max(16 << 20, 2 * used)))
    return rows, num_tiles, n_in_bufs, vmem_limit


def confidence_self_training_loss(y, y_target, threshold: float):
    """Returns (loss scalar, mask (B,), pseudo_labels (B,) int32, confidence (B,))."""
    assert y.ndim == 2 and y.shape == y_target.shape
    batch, num_classes = y.shape
    assert num_classes < (1 << 24)  # pseudo label must round-trip exactly via f32

    # narrow slab for small C (output HBM bytes 16x smaller); keep the
    # lane-dense 128-wide slab only when C is large enough that the output is
    # a trivial share of traffic.
    out_lanes = 8 if num_classes <= 512 else 128

    itemsize = max(y.dtype.itemsize, y_target.dtype.itemsize)
    tb, num_tiles, n_in_bufs, vmem_limit = _plan(batch, num_classes, itemsize,
                                                 out_lanes)

    # TODO(synk): for very large C (>~16K classes on v7x, >~64K on v5e/v6e) add
    # a second 'arbitrary' grid axis over C with online max / LSE accumulation.

    kernel = functools.partial(_self_training_kernel, threshold=float(threshold))

    def _in_spec():
        if n_in_bufs > 2:
            return pl.BlockSpec((tb, num_classes), lambda i: (i, 0),
                                pipeline_mode=pl.Buffered(n_in_bufs))
        return pl.BlockSpec((tb, num_classes), lambda i: (i, 0))

    cost = pl.CostEstimate(
        flops=int(10 * batch * num_classes),
        transcendentals=int(2 * batch * num_classes),
        bytes_accessed=int(batch * num_classes
                           * (y.dtype.itemsize + y_target.dtype.itemsize)
                           + batch * out_lanes * 4),
    )

    packed = pl.pallas_call(
        kernel,
        grid=(num_tiles,),
        out_shape=jax.ShapeDtypeStruct((batch, out_lanes), jnp.float32),
        in_specs=[_in_spec(), _in_spec()],
        out_specs=pl.BlockSpec((tb, out_lanes), lambda i: (i, 0)),
        compiler_params=pltpu.CompilerParams(
            dimension_semantics=("parallel",),
            vmem_limit_bytes=vmem_limit),
        cost_estimate=cost,
    )(y, y_target)

    # single pass over the packed slab
    cols = packed[:, :4]
    mask = cols[:, 0]
    confidence = cols[:, 1]
    pseudo_labels = cols[:, 2].astype(jnp.int32)
    # masked mean over the true batch; ragged padding rows never reach this
    # sum because the output array is exactly (B, out_lanes).
    loss = jnp.sum(cols[:, 3]) / batch
    return loss, mask, pseudo_labels, confidence


def _reference(y, y_target, threshold):
    y32 = y.astype(jnp.float32)
    yt32 = y_target.astype(jnp.float32)
    probs = jax.nn.softmax(yt32, axis=1)
    conf = probs.max(axis=1)
    labels = jnp.argmax(yt32, axis=1).astype(jnp.int32)
    mask = (conf >= threshold).astype(jnp.float32)
    lse = jax.nn.logsumexp(y32, axis=1)
    ce = lse - jnp.take_along_axis(y32, labels[:, None], axis=1)[:, 0]
    loss = jnp.mean(ce * mask)
    return loss, mask, labels, conf


if __name__ == "__main__":
    key = jax.random.PRNGKey(0)
    k1, k2, k3, k4 = jax.random.split(key, 4)

    # ---- test 1: small f32, single tile ----
    B, C, thr = 8, 32, 0.2
    y = jax.random.normal(k1, (B, C), jnp.float32) * 2.0
    yt = jax.random.normal(k2, (B, C), jnp.float32) * 2.0
    out = confidence_self_training_loss(y, yt, thr)
    jax.block_until_ready(out)
    loss, mask, labels, conf = out
    loss_r, mask_r, labels_r, conf_r = _reference(y, yt, thr)
    assert jnp.allclose(loss, loss_r, atol=1e-5), (loss, loss_r)
    assert jnp.allclose(conf, conf_r, atol=1e-6)
    assert jnp.array_equal(labels, labels_r)
    assert jnp.array_equal(mask, mask_r)

    # ---- test 2: bf16 ingestion + ragged batch tiling (2 grid steps) ----
    B, C, thr = 20, 128, 0.15
    y = (jax.random.normal(k3, (B, C), jnp.float32) * 2.0).astype(jnp.bfloat16)
    yt = (jax.random.normal(k4, (B, C), jnp.float32) * 2.0).astype(jnp.bfloat16)
    out = confidence_self_training_loss(y, yt, thr)
    jax.block_until_ready(out)
    loss, mask, labels, conf = out
    loss_r, mask_r, labels_r, conf_r = _reference(y, yt, thr)
    assert jnp.allclose(loss, loss_r, atol=1e-4), (loss, loss_r)
    assert jnp.allclose(conf, conf_r, atol=1e-5)
    assert jnp.array_equal(labels, labels_r)
    assert jnp.array_equal(mask, mask_r)

    print("KERNEL_OK")
</pallas_src>

<mosaic_0001>
module attributes {stable_mosaic.version = 11 : i64} {
  func.func @_self_training_kernel(%arg0: i32, %arg1: memref<8x32xf32, #tpu.memory_space<vmem>>, %arg2: memref<8x32xf32, #tpu.memory_space<vmem>>, %arg3: memref<8x8xf32, #tpu.memory_space<vmem>>) attributes {dimension_semantics = [#tpu.dimension_semantics<parallel>], iteration_bounds = array<i64: 1>, scalar_prefetch = 0 : i64, scratch_operands = 0 : i64, tpu.core_type = #tpu.core_type<tc>, window_params = [{transform_indices = @transform_0, window_bounds = array<i64: 8, 32>}, {transform_indices = @transform_1, window_bounds = array<i64: 8, 32>}, {transform_indices = @transform_2, window_bounds = array<i64: 8, 8>}]} {
    %c0 = arith.constant 0 : index
    %c0_0 = arith.constant 0 : index
    %0 = vector.load %arg1[%c0, %c0_0] : memref<8x32xf32, #tpu.memory_space<vmem>>, vector<8x32xf32>
    %c0_1 = arith.constant 0 : index
    %c0_2 = arith.constant 0 : index
    %1 = vector.load %arg2[%c0_1, %c0_2] : memref<8x32xf32, #tpu.memory_space<vmem>>, vector<8x32xf32>
    %2 = tpu.iota {dimensions = array<i32: 1>} : vector<8x32xi32>
    %cst = arith.constant dense<0xFF800000> : vector<8xf32>
    %3 = vector.multi_reduction <maximumf>, %1, %cst [1] : vector<8x32xf32> to vector<8xf32>
    %4 = vector.shape_cast %3 : vector<8xf32> to vector<8x1xf32>
    %5 = vector.broadcast %4 : vector<8x1xf32> to vector<8x32xf32>
    %6 = arith.subf %1, %5 : vector<8x32xf32>
    %7 = math.exp %6 : vector<8x32xf32>
    %cst_3 = arith.constant dense<0.000000e+00> : vector<8xf32>
    %8 = vector.multi_reduction <add>, %7, %cst_3 [1] : vector<8x32xf32> to vector<8xf32>
    %9 = vector.shape_cast %8 : vector<8xf32> to vector<8x1xf32>
    %cst_4 = arith.constant 1.000000e+00 : f32
    %10 = vector.broadcast %cst_4 : f32 to vector<8x1xf32>
    %11 = arith.divf %10, %9 : vector<8x1xf32>
    %12 = vector.broadcast %4 : vector<8x1xf32> to vector<8x32xf32>
    %13 = arith.cmpf oge, %1, %12 : vector<8x32xf32>
    %c32_i32 = arith.constant 32 : i32
    %14 = vector.broadcast %c32_i32 : i32 to vector<8x32xi32>
    %15 = arith.select %13, %2, %14 : vector<8x32xi1>, vector<8x32xi32>
    %cst_5 = arith.constant dense<2147483647> : vector<8xi32>
    %16 = vector.multi_reduction <minsi>, %15, %cst_5 [1] : vector<8x32xi32> to vector<8xi32>
    %17 = vector.shape_cast %16 : vector<8xi32> to vector<8x1xi32>
    %cst_6 = arith.constant 5.000000e+00 : f32
    %18 = vector.broadcast %cst_6 : f32 to vector<8x1xf32>
    %19 = arith.cmpf ole, %9, %18 : vector<8x1xf32>
    %20 = arith.extui %19 : vector<8x1xi1> to vector<8x1xi32>
    %21 = arith.sitofp %20 : vector<8x1xi32> to vector<8x1xf32>
    %cst_7 = arith.constant dense<0xFF800000> : vector<8xf32>
    %22 = vector.multi_reduction <maximumf>, %0, %cst_7 [1] : vector<8x32xf32> to vector<8xf32>
    %23 = vector.shape_cast %22 : vector<8xf32> to vector<8x1xf32>
    %24 = vector.broadcast %23 : vector<8x1xf32> to vector<8x32xf32>
    %25 = arith.subf %0, %24 : vector<8x32xf32>
    %26 = math.exp %25 : vector<8x32xf32>
    %cst_8 = arith.constant dense<0.000000e+00> : vector<8xf32>
    %27 = vector.multi_reduction <add>, %26, %cst_8 [1] : vector<8x32xf32> to vector<8xf32>
    %28 = vector.shape_cast %27 : vector<8xf32> to vector<8x1xf32>
    %29 = math.log %28 : vector<8x1xf32>
    %30 = arith.addf %29, %23 : vector<8x1xf32>
    %31 = vector.broadcast %17 : vector<8x1xi32> to vector<8x32xi32>
    %32 = arith.cmpi eq, %2, %31 : vector<8x32xi32>
    %cst_9 = arith.constant 0.000000e+00 : f32
    %33 = vector.broadcast %cst_9 : f32 to vector<8x32xf32>
    %34 = arith.select %32, %0, %33 : vector<8x32xi1>, vector<8x32xf32>
    %cst_10 = arith.constant dense<0.000000e+00> : vector<8xf32>
    %35 = vector.multi_reduction <add>, %34, %cst_10 [1] : vector<8x32xf32> to vector<8xf32>
    %36 = vector.shape_cast %35 : vector<8xf32> to vector<8x1xf32>
    %37 = arith.subf %30, %36 : vector<8x1xf32>
    %38 = arith.mulf %37, %21 : vector<8x1xf32>
    %39 = arith.sitofp %17 : vector<8x1xi32> to vector<8x1xf32>
    %40 = tpu.iota {dimensions = array<i32: 1>} : vector<8x8xi32>
    %c0_i32 = arith.constant 0 : i32
    %41 = vector.broadcast %c0_i32 : i32 to vector<8x8xi32>
    %42 = arith.cmpi eq, %40, %41 : vector<8x8xi32>
    %c1_i32 = arith.constant 1 : i32
    %43 = vector.broadcast %c1_i32 : i32 to vector<8x8xi32>
    %44 = arith.cmpi eq, %40, %43 : vector<8x8xi32>
    %c2_i32 = arith.constant 2 : i32
    %45 = vector.broadcast %c2_i32 : i32 to vector<8x8xi32>
    %46 = arith.cmpi eq, %40, %45 : vector<8x8xi32>
    %c3_i32 = arith.constant 3 : i32
    %47 = vector.broadcast %c3_i32 : i32 to vector<8x8xi32>
    %48 = arith.cmpi eq, %40, %47 : vector<8x8xi32>
    %cst_11 = arith.constant 0.000000e+00 : f32
    %49 = vector.shape_cast %38 : vector<8x1xf32> to vector<8x1xf32>
    %50 = vector.broadcast %49 : vector<8x1xf32> to vector<8x8xf32>
    %51 = vector.broadcast %cst_11 : f32 to vector<8x8xf32>
    %52 = arith.select %48, %50, %51 : vector<8x8xi1>, vector<8x8xf32>
    %53 = vector.shape_cast %39 : vector<8x1xf32> to vector<8x1xf32>
    %54 = vector.broadcast %53 : vector<8x1xf32> to vector<8x8xf32>
    %55 = arith.select %46, %54, %52 : vector<8x8xi1>, vector<8x8xf32>
    %56 = vector.shape_cast %11 : vector<8x1xf32> to vector<8x1xf32>
    %57 = vector.broadcast %56 : vector<8x1xf32> to vector<8x8xf32>
    %58 = arith.select %44, %57, %55 : vector<8x8xi1>, vector<8x8xf32>
    %59 = vector.shape_cast %21 : vector<8x1xf32> to vector<8x1xf32>
    %60 = vector.broadcast %59 : vector<8x1xf32> to vector<8x8xf32>
    %61 = arith.select %42, %60, %58 : vector<8x8xi1>, vector<8x8xf32>
    %c0_12 = arith.constant 0 : index
    %c0_13 = arith.constant 0 : index
    %62 = vector.load %arg3[%c0_12, %c0_13] : memref<8x8xf32, #tpu.memory_space<vmem>>, vector<8x8xf32>
    tpu.vector_store %arg3[%c0_12, %c0_13], %61 {strides = array<i32>} : memref<8x8xf32, #tpu.memory_space<vmem>>, vector<8x8xf32>,
    return
  }
  func.func @transform_0(%arg0: i32) -> (i32, i32) {
    %c0_i32 = arith.constant 0 : i32
    %c0_i32_0 = arith.constant 0 : i32
    return %arg0, %c0_i32 : i32, i32
  }
  func.func @transform_1(%arg0: i32) -> (i32, i32) {
    %c0_i32 = arith.constant 0 : i32
    %c0_i32_0 = arith.constant 0 : i32
    return %arg0, %c0_i32 : i32, i32
  }
  func.func @transform_2(%arg0: i32) -> (i32, i32) {
    %c0_i32 = arith.constant 0 : i32
    %c0_i32_0 = arith.constant 0 : i32
    return %arg0, %c0_i32 : i32, i32
  }
}

</mosaic_0001>

<bundles_post_ra>
// kernel: tpu_custom_call.1
= control target key start
LH: loop header
LB: loop body
LE: loop exit
PB: predicated region body
PF: predicated region fallthrough
CT: control target
= control target key end

     0   :  { %7 = vsyncpa [#allocation3], 0  ;;  %s272_s0 = inlined_call_operand.hbm [shape: f32[8,32], index: 0, kind: input, shape index: {}]   ;;  %s273_s1 = inlined_call_operand.hbm [shape: f32[8,32], index: 1, kind: input, shape index: {}]   ;;  %s274_s2 = inlined_call_operand.hbm [shape: f32[8,8], index: 2, kind: output, shape index: {}]  }
   0x1   :  { %8 = vsyncpa [#allocation6], 0 }
   0x2   :  { %9 = vsyncpa [#allocation4], 0  ;;  %s203_s9 = smov [#allocation2]   ;;  %s204_s11 = smov [#allocation5]  }
   0x3   :  { %s16_s10 = sshll.u32 %s203_s9, 4  ;;  %s26_s12 = sshll.u32 %s204_s11, 4  ;;  %s17_s10 = int_to_ptr.vmem [resolvable:$true] %s16_s10  ;;  %s27_s12 = int_to_ptr.vmem [resolvable:$true] %s26_s12 }
   0x4   :  { %s131_s15 = scalar_lea.hbm %s272_s0, 128 }
   0x5   :  { %p132_p0 = scmp.ne.s32.totalorder %s272_s0, %s131_s15  ;;  %p135_p1 = scmp.lt.u32.totalorder %s131_s15, %s272_s0 }
   0x7   :  { %p137_p2 = pnand %p135_p1, %p132_p0 }
   0x9   :  { %140 = shalt.err (!%p137_p2)
}
   0xa   :  { %s141_s20 = scalar_lea.vmem %s17_s10, 128  ;;  %p146_p4 = scmp.lt.s32.totalorder %s17_s10, %s17_s10 }
   0xb   :  { %p142_p3 = scmp.ne.s32.totalorder %s17_s10, %s141_s20  ;;  %p147_p5 = scmp.lt.s32.totalorder %s141_s20, %s141_s20 }
   0xd   :  { %p148_p6 = por %p147_p5, %p146_p4 }
   0xf   :  { %p149_p7 = pnand %p148_p6, %p142_p3 }
  0x11   :  { %152 = shalt.err (!%p149_p7)
}
  0x12   :  { %19 = dma.hbm_to_vmem [thread:$0]  %s272_s0, 128, %s17_s10, [#allocation3]  }
  0x13   :  { %s153_s25 = scalar_lea.hbm %s273_s1, 128 }
  0x14   :  { %p154_p8 = scmp.ne.s32.totalorder %s273_s1, %s153_s25  ;;  %p157_p9 = scmp.lt.u32.totalorder %s153_s25, %s273_s1 }
  0x16   :  { %p159_p10 = pnand %p157_p9, %p154_p8 }
  0x18   :  { %162 = shalt.err (!%p159_p10)
}
  0x19   :  { %s163_s30 = scalar_lea.vmem %s27_s12, 128  ;;  %p168_p12 = scmp.lt.s32.totalorder %s27_s12, %s27_s12 }
  0x1a   :  { %p164_p11 = scmp.ne.s32.totalorder %s27_s12, %s163_s30  ;;  %p169_p13 = scmp.lt.s32.totalorder %s163_s30, %s163_s30 }
  0x1c   :  { %p170_p0 = por %p169_p13, %p168_p12 }
  0x1e   :  { %p171_p1 = pnand %p170_p0, %p164_p11 }
  0x20   :  { %174 = shalt.err (!%p171_p1)
}
  0x21   :  { %29 = dma.hbm_to_vmem [thread:$0]  %s273_s1, 128, %s27_s12, [#allocation6]  }
  0x22   :  { %197 = dma.done.wait [#allocation3], 128  }
  0x23   :  { %198 = vsyncadd [#allocation3], 4294967168 }
  0x24   :  { %199 = dma.done.wait [#allocation6], 128  }
  0x25   :  { %200 = vsyncadd [#allocation6], 4294967168  ;;  %vm40_vm0 = vcmask 261120   ;;  %v37_v0 = vld [vmem:[#allocation5] sm:$0xff]  ;;  %v36_v1 = vld [vmem:[#allocation2] sm:$0xff]  ;;  %v38_v4 = vlaneseq  ;;  %v205_v38 = vmov 0.0  }
  0x26   :  { %v41_v2 = vsel %vm40_vm0, %v37_v0, -inf  ;;  %v72_v3 = vsel %vm40_vm0, %v36_v1, -inf  ;;  %s206_s1 = smov [#allocation7]   ;;  %vm100_vm9 = vcmask 64512  }
  0x27   :  { %42 = vmax.xlane.f32.xlu0 %v41_v2  ;;  %73 = vmax.xlane.f32.xlu1 %v72_v3  ;;  %v248_v5 = vand.u32 127, %v38_v4  ;;  %s108_s4 = sshll.u32 %s206_s1, 4  ;;  %s109_s4 = int_to_ptr.vmem [resolvable:$true] %s108_s4 }
  0x28   :  { %s175_s5 = scalar_lea.vmem %s109_s4, 128  ;;  %p180_p3 = scmp.lt.s32.totalorder %s109_s4, %s109_s4 }
  0x29   :  { %vm95_vm5 = vcmp.eq.s32.totalorder %v248_v5, 3  ;;  %vm94_vm6 = vcmp.eq.s32.totalorder %v248_v5, 2  ;;  %vm93_vm7 = vcmp.eq.s32.totalorder %v248_v5, 1  ;;  %vm92_vm8 = vcmp.eq.s32.totalorder %v248_v5, 0  ;;  %p176_p2 = scmp.ne.s32.totalorder %s109_s4, %s175_s5  ;;  %p181_p4 = scmp.lt.s32.totalorder %s175_s5, %s175_s5 }
  0x2b   :  { %p182_p5 = por %p181_p4, %p180_p3 }
  0x2d   :  { %p183_p6 = pnand %p182_p5, %p176_p2 }
  0xb4   :  { %v43_v6 = vpop.xlane.xlu0 %42  ;;  %v74_v7 = vpop.xlane.xlu1 %73 }
  0xb5   :  { %vm52_vm1 = vcmp.ge.f32.partialorder %v37_v0, %v43_v6  ;;  %v75_v8 = vsub.f32 %v36_v1, %v74_v7  ;;  %v44_v16 = vsub.f32 %v37_v0, %v43_v6 }
  0xb6   :  { %v53_v9 = vsel %vm52_vm1, %v248_v5, 32 }
  0xb7   :  { %v54_v10 = vsel %vm40_vm0, %v53_v9, 2147483647  ;;  %v76_v11 = vmul.f32 1.442695, %v75_v8  ;;  %v45_v17 = vmul.f32 1.442695, %v44_v16 }
  0xb8   :  { %v56_v12 = vshra.s32 %v54_v10, 16  ;;  %v55_v18 = vand.u32 65535, %v54_v10 }
  0xb9   :  { %123 = vpow2.f32 %v76_v11 }
  0xba   :  { %v58_v13 = vcvt.s32.f32 %v56_v12  ;;  %125 = vpow2.f32 %v45_v17  ;;  %v57_v20 = vcvt.s32.f32 %v55_v18 }
  0xbc   :  { %59 = vmin.xlane.f32.xlu0 %v58_v13 }
  0xc3   :  { %v124_v14 = vpop.eup %123 }
  0xc4   :  { %v78_v15 = vsel %vm40_vm0, %v124_v14, 0.0  ;;  %v126_v22 = vpop.eup %125 }
  0xc5   :  { %79 = vadd.xlane.f32.xlu0 %v78_v15  ;;  %v47_v23 = vsel %vm40_vm0, %v126_v22, 0.0 }
 0x149   :  { %v60_v19 = vpop.xlane.xlu0 %59 }
 0x14a   :  { %vm61_vm2 = vcmp.eq.f32.partialorder %v58_v13, %v60_v19  ;;  %v66_v24 = vcvt.f32.s32 %v60_v19 }
 0x14b   :  { %v62_v21 = vsel %vm61_vm2, %v57_v20, inf }
 0x14c   :  { %63 = vmin.xlane.f32.xlu1 %v62_v21  ;;  %v67_v26 = vshll.u32 %v66_v24, 16 }
 0x150   :  { %48 = vadd.xlane.f32.xlu1 %v47_v23 }
 0x152   :  { %v80_v31 = vpop.xlane.xlu0 %79 }
 0x153   :  { %127 = vlog2.f32 %v80_v31 }
 0x15d   :  { %v128_v32 = vpop.eup %127 }
 0x15e   :  { %v82_v34 = vmul.f32 0.6931472, %v128_v32 }
 0x160   :  { %v83_v35 = vadd.f32 %v82_v34, %v74_v7 }
 0x1d9   :  { %v64_v25 = vpop.xlane.xlu1 %63 }
 0x1da   :  { %v65_v27 = vcvt.f32.s32 %v64_v25 }
 0x1dc   :  { %v68_v28 = vadd.s32 %v67_v26, %v65_v27 }
 0x1dd   :  { %v49_v33 = vpop.xlane.xlu1 %48 }
 0x1de   :  { %vm84_vm3 = vcmp.eq.s32.totalorder %v248_v5, %v68_v28  ;;  %129 = vrcp.f32 %v49_v33  ;;  %vm69_vm4 = vcmp.le.f32.partialorder %v49_v33, 5.0  ;;  %v91_v41 = vcvt.s32.f32 %v68_v28 }
 0x1df   :  { %v85_v29 = vsel %vm84_vm3, %v36_v1, 0.0  ;;  %v118_v39 = vsel %vm69_vm4, 1.0, %v205_v38 }
 0x1e0   :  { %v86_v30 = vsel %vm40_vm0, %v85_v29, 0.0 }
 0x1e1   :  { %87 = vadd.xlane.f32.xlu0 %v86_v30 }
 0x1e8   :  { %v130_v43 = vpop.eup %129 }
 0x26e   :  { %v88_v36 = vpop.xlane.xlu0 %87 }
 0x26f   :  { %v89_v37 = vsub.f32 %v83_v35, %v88_v36 }
 0x271   :  { %v90_v40 = vmul.f32 %v118_v39, %v89_v37 }
 0x273   :  { %v96_v42 = vsel %vm95_vm5, %v90_v40, 0.0 }
 0x274   :  { %v97_v44 = vsel %vm94_vm6, %v91_v41, %v96_v42 }
 0x275   :  { %v98_v45 = vsel %vm93_vm7, %v130_v43, %v97_v44 }
 0x276   :  { %v99_v46 = vsel %vm92_vm8, %v118_v39, %v98_v45 }
 0x277   :  { %101 = vst.msk [vmem:[#allocation7] sm:$0xff] %vm100_vm9, %v99_v46 }
 0x278   :  { %186 = shalt.err (!%p183_p6)
}
 0x279   :  { %s187_s8 = scalar_lea.hbm %s274_s2, 128 }
 0x27a   :  { %p188_p7 = scmp.ne.s32.totalorder %s274_s2, %s187_s8  ;;  %p191_p8 = scmp.lt.u32.totalorder %s187_s8, %s274_s2 }
 0x27c   :  { %p193_p9 = pnand %p191_p8, %p188_p7 }
 0x27e   :  { %196 = shalt.err (!%p193_p9)
}
 0x27f   :  { %111 = dma.vmem_to_hbm [thread:$0]  %s109_s4, 128, %s274_s2, [#allocation4]  }
 0x280   :  { %201 = dma.done.wait [#allocation4], 128  }
 0x281   :  { %202 = vsyncadd [#allocation4], 4294967168 }
 0x282   :  { %115 = vsyncpa [#allocation3], 1 }
 0x283   :  { %116 = vsyncpa [#allocation6], 1 }
 0x284   :  { %117 = vsyncpa [#allocation4], 1 }

</bundles_post_ra>
